<compile_context>
chip_gen: v7x
topology: tpu7x:2x2x1
jax: 0.10.0
libtpu: 0.0.40
codegen_flags: <defaults>
</compile_context>

<pallas_src>
import jax
import jax.numpy as jnp
from jax.experimental import pallas as pl
from jax.experimental.pallas import tpu as pltpu

LANES = 128
MAX_BLOCK_ROWS = 2048   # (2048,128) f32 block = 1 MiB/input; x2 inputs x2 bufs = 4 MiB
NUM_SPLITS = 2          # leading "parallel" axis (uses both TCs on v7x)


def masked_smooth_l1_loss(pred, target, max_block_rows=MAX_BLOCK_ROWS):
    assert pred.shape == target.shape, "inconsistent dimensions"

    n = pred.size
    flat_p = pred.reshape(-1)            # free metadata reshape, native dtype
    flat_t = target.reshape(-1)

    # Minimal pad (<128 elems) only when the count is not lane-aligned.
    # Padded target slots are 0, so the target>0 mask already excludes them.
    pad = (-n) % LANES
    if pad:
        flat_p = jnp.pad(flat_p, (0, pad))
        flat_t = jnp.pad(flat_t, (0, pad))

    rows = (n + pad) // LANES
    p2 = flat_p.reshape(rows, LANES)     # free metadata reshape
    t2 = flat_t.reshape(rows, LANES)

    # Block geometry: full-extent block for small inputs, (MAX_BLOCK_ROWS,128)
    # otherwise (multiple of 8, lane-dense).
    block_rows = rows if rows <= max_block_rows else max_block_rows
    total_blocks = pl.cdiv(rows, block_rows)
    num_splits = NUM_SPLITS if total_blocks >= NUM_SPLITS else 1
    blocks_per_split = pl.cdiv(total_blocks, num_splits)

    # A grid step can read garbage / duplicated data only when the last block
    # is ragged or the split duplicates a clamped block; only then do we pay
    # for the global-index iota mask.
    needs_gidx_mask = (rows % block_rows != 0) or \
                      (num_splits * blocks_per_split != total_blocks)

    def in_index_map(s, j):
        b = s * blocks_per_split + j
        # Clamp: "padding" blocks of the last split re-read the final
        # in-bounds block; their contribution is fully masked in-kernel via
        # the global-element-index check against the true count.
        return (jnp.minimum(b, total_blocks - 1), 0)

    def out_index_map(s, j):
        return (s, 0)

    def kernel(p_ref, t_ref, sum_ref, cnt_ref):
        j = pl.program_id(1)

        # Per-split accumulator init (output block is VMEM-resident across j).
        @pl.when(j == 0)
        def _():
            sum_ref[...] = jnp.zeros_like(sum_ref)
            cnt_ref[...] = jnp.zeros_like(cnt_ref)

        p = p_ref[...].astype(jnp.float32)   # upcast on load (native HBM dtype)
        t = t_ref[...].astype(jnp.float32)
        r = p.shape[0]                       # static block row count

        valid = t > 0.0
        if needs_gidx_mask:
            s = pl.program_id(0)
            # Global element index of each slot, computed from the *logical*
            # (unclamped) grid position: masks (a) the partially OOB ragged
            # tail block and (b) duplicated clamped blocks of the last split.
            start_row = (s * blocks_per_split + j) * r
            row_iota = jax.lax.broadcasted_iota(jnp.int32, (r, LANES), 0)
            lane_iota = jax.lax.broadcasted_iota(jnp.int32, (r, LANES), 1)
            gidx = (start_row + row_iota) * LANES + lane_iota
            valid = jnp.logical_and(valid, gidx < n)

        d = p - t
        ad = jnp.abs(d)
        elem = jnp.where(ad < 1.0, 0.5 * d * d, ad - 0.5)
        elem = jnp.where(valid, elem, 0.0)   # select (safe vs. garbage/NaN slots)
        vcnt = valid.astype(jnp.int32)

        if r % 8 == 0:
            # Fold block rows into one (8,128) vreg tile with pure VPU adds
            # (the reshape preserves (8,128) tiling: zero data movement).
            sum_ref[...] += elem.reshape(r // 8, 8, LANES).sum(axis=0)
            cnt_ref[...] += vcnt.reshape(r // 8, 8, LANES).sum(axis=0)
        else:
            # Tiny full-extent block whose row count isn't a multiple of 8
            # (only happens when the whole input is a single small block).
            sum_ref[0:1, :] = sum_ref[0:1, :] + elem.sum(axis=0, keepdims=True)
            cnt_ref[0:1, :] = cnt_ref[0:1, :] + vcnt.sum(axis=0, keepdims=True)

    bytes_accessed = int(p2.size) * p2.dtype.itemsize \
                   + int(t2.size) * t2.dtype.itemsize \
                   + 2 * num_splits * 8 * LANES * 4
    cost = pl.CostEstimate(flops=8 * int(n), transcendentals=0,
                           bytes_accessed=bytes_accessed)

    sums, cnts = pl.pallas_call(
        kernel,
        out_shape=(
            jax.ShapeDtypeStruct((num_splits * 8, LANES), jnp.float32),
            jax.ShapeDtypeStruct((num_splits * 8, LANES), jnp.int32),
        ),
        grid_spec=pltpu.PrefetchScalarGridSpec(
            num_scalar_prefetch=0,
            grid=(num_splits, blocks_per_split),
            in_specs=[
                pl.BlockSpec((block_rows, LANES), in_index_map),
                pl.BlockSpec((block_rows, LANES), in_index_map),
            ],
            out_specs=[
                pl.BlockSpec((8, LANES), out_index_map),
                pl.BlockSpec((8, LANES), out_index_map),
            ],
        ),
        compiler_params=pltpu.CompilerParams(
            dimension_semantics=("parallel", "arbitrary"),
        ),
        cost_estimate=cost,
    )(p2, t2)

    # Tiny (8 KiB) final reduce + divide in the wrapper.
    total_sum = jnp.sum(sums)
    total_cnt = jnp.sum(cnts).astype(jnp.float32)
    return total_sum / total_cnt     # 0/0 -> NaN, matching torch mean of empty


def _reference(pred, target):
    p = pred.astype(jnp.float32).reshape(-1)
    t = target.astype(jnp.float32).reshape(-1)
    mask = t > 0.0
    d = p - t
    ad = jnp.abs(d)
    elem = jnp.where(ad < 1.0, 0.5 * d * d, ad - 0.5)
    return jnp.sum(jnp.where(mask, elem, 0.0)) / jnp.sum(mask.astype(jnp.float32))


if __name__ == "__main__":
    key = jax.random.PRNGKey(0)
    k1, k2, k3, k4 = jax.random.split(key, 4)

    # Test 1: NCHW-shaped f32 input (single full-extent block, fold path).
    shape1 = (2, 4, 16, 16)
    pred1 = jax.random.normal(k1, shape1, dtype=jnp.float32)
    target1 = jax.random.normal(k2, shape1, dtype=jnp.float32) * 2.0
    loss1 = jax.block_until_ready(masked_smooth_l1_loss(pred1, target1))
    ref1 = jax.block_until_ready(_reference(pred1, target1))
    assert jnp.allclose(loss1, ref1, atol=1e-5, rtol=1e-5), (loss1, ref1)

    # Test 2: non-lane-aligned size in native bf16 (exercises the minimal lane
    # pad, in-kernel upcast, and the odd-row-count accumulation branch).
    shape2 = (2, 4, 31, 31)   # 7688 elements, not a multiple of 128
    pred2 = jax.random.normal(k3, shape2, dtype=jnp.float32).astype(jnp.bfloat16)
    target2 = (jax.random.normal(k4, shape2, dtype=jnp.float32) * 2.0).astype(jnp.bfloat16)
    loss2 = jax.block_until_ready(masked_smooth_l1_loss(pred2, target2))
    ref2 = jax.block_until_ready(_reference(pred2, target2))
    assert jnp.allclose(loss2, ref2, atol=1e-5, rtol=1e-5), (loss2, ref2)

    # Test 3: same data, forced small blocks -> exercises the multi-block
    # grid, the 2-way "parallel" split, clamped/duplicated tail blocks, and
    # the global-index tail mask.
    loss3 = jax.block_until_ready(
        masked_smooth_l1_loss(pred2, target2, max_block_rows=8))
    assert jnp.allclose(loss3, ref2, atol=1e-5, rtol=1e-5), (loss3, ref2)

    print("KERNEL_OK")
</pallas_src>

<mosaic_0001>
module attributes {stable_mosaic.version = 11 : i64} {
  func.func @kernel(%arg0: i32, %arg1: i32, %arg2: memref<16x128xf32, #tpu.memory_space<vmem>>, %arg3: memref<16x128xf32, #tpu.memory_space<vmem>>, %arg4: memref<8x128xf32, #tpu.memory_space<vmem>>, %arg5: memref<8x128xi32, #tpu.memory_space<vmem>>) attributes {dimension_semantics = [#tpu.dimension_semantics<parallel>, #tpu.dimension_semantics<arbitrary>], iteration_bounds = array<i64: 1, 1>, scalar_prefetch = 0 : i64, scratch_operands = 0 : i64, tpu.core_type = #tpu.core_type<tc>, window_params = [{transform_indices = @transform_0, window_bounds = array<i64: 16, 128>}, {transform_indices = @transform_1, window_bounds = array<i64: 16, 128>}, {transform_indices = @transform_2, window_bounds = array<i64: 8, 128>}, {transform_indices = @transform_3, window_bounds = array<i64: 8, 128>}]} {
    %c0_i32 = arith.constant 0 : i32
    %0 = arith.cmpi eq, %arg1, %c0_i32 : i32
    %1 = arith.extui %0 : i1 to i32
    %c0_i32_0 = arith.constant 0 : i32
    %2 = arith.cmpi ne, %1, %c0_i32_0 : i32
    scf.if %2 {
      %cst_18 = arith.constant 0.000000e+00 : f32
      %30 = vector.broadcast %cst_18 : f32 to vector<8x128xf32>
      %c0_19 = arith.constant 0 : index
      %c0_20 = arith.constant 0 : index
      %31 = vector.load %arg4[%c0_19, %c0_20] : memref<8x128xf32, #tpu.memory_space<vmem>>, vector<8x128xf32>
      tpu.vector_store %arg4[%c0_19, %c0_20], %30 {strides = array<i32>} : memref<8x128xf32, #tpu.memory_space<vmem>>, vector<8x128xf32>,
      %c0_i32_21 = arith.constant 0 : i32
      %32 = vector.broadcast %c0_i32_21 : i32 to vector<8x128xi32>
      %c0_22 = arith.constant 0 : index
      %c0_23 = arith.constant 0 : index
      %33 = vector.load %arg5[%c0_22, %c0_23] : memref<8x128xi32, #tpu.memory_space<vmem>>, vector<8x128xi32>
      tpu.vector_store %arg5[%c0_22, %c0_23], %32 {strides = array<i32>} : memref<8x128xi32, #tpu.memory_space<vmem>>, vector<8x128xi32>,
    } else {
    }
    %c0 = arith.constant 0 : index
    %c0_1 = arith.constant 0 : index
    %3 = vector.load %arg2[%c0, %c0_1] : memref<16x128xf32, #tpu.memory_space<vmem>>, vector<16x128xf32>
    %c0_2 = arith.constant 0 : index
    %c0_3 = arith.constant 0 : index
    %4 = vector.load %arg3[%c0_2, %c0_3] : memref<16x128xf32, #tpu.memory_space<vmem>>, vector<16x128xf32>
    %cst = arith.constant 0.000000e+00 : f32
    %5 = vector.broadcast %cst : f32 to vector<16x128xf32>
    %6 = arith.cmpf ogt, %4, %5 : vector<16x128xf32>
    %7 = arith.subf %3, %4 : vector<16x128xf32>
    %8 = math.absf %7 : vector<16x128xf32>
    %cst_4 = arith.constant 1.000000e+00 : f32
    %9 = vector.broadcast %cst_4 : f32 to vector<16x128xf32>
    %10 = arith.cmpf olt, %8, %9 : vector<16x128xf32>
    %cst_5 = arith.constant 5.000000e-01 : f32
    %11 = vector.broadcast %cst_5 : f32 to vector<16x128xf32>
    %12 = arith.mulf %11, %7 : vector<16x128xf32>
    %13 = arith.mulf %12, %7 : vector<16x128xf32>
    %cst_6 = arith.constant 5.000000e-01 : f32
    %14 = vector.broadcast %cst_6 : f32 to vector<16x128xf32>
    %15 = arith.subf %8, %14 : vector<16x128xf32>
    %16 = arith.select %10, %13, %15 : vector<16x128xi1>, vector<16x128xf32>
    %cst_7 = arith.constant 0.000000e+00 : f32
    %17 = vector.broadcast %cst_7 : f32 to vector<16x128xf32>
    %18 = arith.select %6, %16, %17 : vector<16x128xi1>, vector<16x128xf32>
    %19 = arith.extui %6 : vector<16x128xi1> to vector<16x128xi32>
    %c0_8 = arith.constant 0 : index
    %c0_9 = arith.constant 0 : index
    %20 = vector.load %arg4[%c0_8, %c0_9] : memref<8x128xf32, #tpu.memory_space<vmem>>, vector<8x128xf32>
    %21 = vector.shape_cast %18 : vector<16x128xf32> to vector<2x8x128xf32>
    %cst_10 = arith.constant dense<0.000000e+00> : vector<8x128xf32>
    %22 = vector.multi_reduction <add>, %21, %cst_10 [0] : vector<2x8x128xf32> to vector<8x128xf32>
    %23 = arith.addf %20, %22 : vector<8x128xf32>
    %c0_11 = arith.constant 0 : index
    %c0_12 = arith.constant 0 : index
    %24 = vector.load %arg4[%c0_11, %c0_12] : memref<8x128xf32, #tpu.memory_space<vmem>>, vector<8x128xf32>
    tpu.vector_store %arg4[%c0_11, %c0_12], %23 {strides = array<i32>} : memref<8x128xf32, #tpu.memory_space<vmem>>, vector<8x128xf32>,
    %c0_13 = arith.constant 0 : index
    %c0_14 = arith.constant 0 : index
    %25 = vector.load %arg5[%c0_13, %c0_14] : memref<8x128xi32, #tpu.memory_space<vmem>>, vector<8x128xi32>
    %26 = vector.shape_cast %19 : vector<16x128xi32> to vector<2x8x128xi32>
    %cst_15 = arith.constant dense<0> : vector<8x128xi32>
    %27 = vector.multi_reduction <add>, %26, %cst_15 [0] : vector<2x8x128xi32> to vector<8x128xi32>
    %28 = arith.addi %25, %27 : vector<8x128xi32>
    %c0_16 = arith.constant 0 : index
    %c0_17 = arith.constant 0 : index
    %29 = vector.load %arg5[%c0_16, %c0_17] : memref<8x128xi32, #tpu.memory_space<vmem>>, vector<8x128xi32>
    tpu.vector_store %arg5[%c0_16, %c0_17], %28 {strides = array<i32>} : memref<8x128xi32, #tpu.memory_space<vmem>>, vector<8x128xi32>,
    return
  }
  func.func @transform_0(%arg0: i32, %arg1: i32) -> (i32, i32) {
    %c1_i32 = arith.constant 1 : i32
    %0 = arith.muli %arg0, %c1_i32 : i32
    %1 = arith.addi %0, %arg1 : i32
    %c0_i32 = arith.constant 0 : i32
    %2 = arith.minsi %1, %c0_i32 : i32
    %c0_i32_0 = arith.constant 0 : i32
    %c0_i32_1 = arith.constant 0 : i32
    return %2, %c0_i32_0 : i32, i32
  }
  func.func @transform_1(%arg0: i32, %arg1: i32) -> (i32, i32) {
    %c1_i32 = arith.constant 1 : i32
    %0 = arith.muli %arg0, %c1_i32 : i32
    %1 = arith.addi %0, %arg1 : i32
    %c0_i32 = arith.constant 0 : i32
    %2 = arith.minsi %1, %c0_i32 : i32
    %c0_i32_0 = arith.constant 0 : i32
    %c0_i32_1 = arith.constant 0 : i32
    return %2, %c0_i32_0 : i32, i32
  }
  func.func @transform_2(%arg0: i32, %arg1: i32) -> (i32, i32) {
    %c0_i32 = arith.constant 0 : i32
    %c0_i32_0 = arith.constant 0 : i32
    return %arg0, %c0_i32 : i32, i32
  }
  func.func @transform_3(%arg0: i32, %arg1: i32) -> (i32, i32) {
    %c0_i32 = arith.constant 0 : i32
    %c0_i32_0 = arith.constant 0 : i32
    return %arg0, %c0_i32 : i32, i32
  }
}

</mosaic_0001>

<bundles_post_ra>
// kernel: tpu_custom_call.1
= control target key start
LH: loop header
LB: loop body
LE: loop exit
PB: predicated region body
PF: predicated region fallthrough
CT: control target
= control target key end

     0   :  { %9 = vsyncpa [#allocation3], 0  ;;  %s320_s0 = inlined_call_operand.hbm [shape: f32[16,128], index: 0, kind: input, shape index: {}]   ;;  %s321_s1 = inlined_call_operand.hbm [shape: f32[16,128], index: 1, kind: input, shape index: {}]   ;;  %s322_s2 = inlined_call_operand.hbm [shape: f32[8,128], index: 2, kind: output, shape index: {0}]   ;;  %s323_s3 = inlined_call_operand.hbm [shape: s32[8,128], index: 3, kind: output, shape index: {1}]  }
   0x1   :  { %10 = vsyncpa [#allocation6], 0 }
   0x2   :  { %11 = vsyncpa [#allocation4], 0 }
   0x3   :  { %12 = vsyncpa [#allocation9], 0  ;;  %s241_s12 = smov [#allocation2]   ;;  %s145_s16 = scalar_lea.hbm %s320_s0, 256 }
   0x4   :  { %s24_s13 = sshll.u32 %s241_s12, 4  ;;  %p146_p0 = scmp.ne.s32.totalorder %s320_s0, %s145_s16  ;;  %s25_s13 = int_to_ptr.vmem [resolvable:$true] %s24_s13 }
   0x5   :  { %p149_p1 = scmp.lt.u32.totalorder %s145_s16, %s320_s0 }
   0x7   :  { %p151_p2 = pnand %p149_p1, %p146_p0 }
   0x9   :  { %154 = shalt.err (!%p151_p2)
}
   0xa   :  { %s155_s21 = scalar_lea.vmem %s25_s13, 256  ;;  %p160_p4 = scmp.lt.s32.totalorder %s25_s13, %s25_s13 }
   0xb   :  { %p156_p3 = scmp.ne.s32.totalorder %s25_s13, %s155_s21  ;;  %p161_p5 = scmp.lt.s32.totalorder %s155_s21, %s155_s21 }
   0xd   :  { %p162_p6 = por %p161_p5, %p160_p4 }
   0xf   :  { %p163_p7 = pnand %p162_p6, %p156_p3 }
  0x11   :  { %166 = shalt.err (!%p163_p7)
}
  0x12   :  { %s242_s22 = smov 128   ;;  %s243_s23 = smov 8  }
  0x13   :  { %30 = dma.hbm_to_vmem [thread:$0]  %s320_s0, 256, %s25_s13, [#allocation3], %s242_s22, %s242_s22, %s243_s23  }
  0x14   :  { %s244_s26 = smov [#allocation5]   ;;  %s167_s30 = scalar_lea.hbm %s321_s1, 256 }
  0x15   :  { %s42_s27 = sshll.u32 %s244_s26, 4  ;;  %p168_p8 = scmp.ne.s32.totalorder %s321_s1, %s167_s30  ;;  %s43_s27 = int_to_ptr.vmem [resolvable:$true] %s42_s27 }
  0x16   :  { %p171_p9 = scmp.lt.u32.totalorder %s167_s30, %s321_s1 }
  0x18   :  { %p173_p10 = pnand %p171_p9, %p168_p8 }
  0x1a   :  { %176 = shalt.err (!%p173_p10)
}
  0x1b   :  { %s177_s8 = scalar_lea.vmem %s43_s27, 256  ;;  %p182_p12 = scmp.lt.s32.totalorder %s43_s27, %s43_s27 }
  0x1c   :  { %p178_p11 = scmp.ne.s32.totalorder %s43_s27, %s177_s8  ;;  %p183_p13 = scmp.lt.s32.totalorder %s177_s8, %s177_s8 }
  0x1e   :  { %p184_p0 = por %p183_p13, %p182_p12 }
  0x20   :  { %p185_p1 = pnand %p184_p0, %p178_p11 }
  0x22   :  { %188 = shalt.err (!%p185_p1)
}
  0x23   :  { %48 = dma.hbm_to_vmem [thread:$0]  %s321_s1, 256, %s43_s27, [#allocation6], %s242_s22, %s242_s22, %s243_s23  }
  0x24   :  { %233 = dma.done.wait [#allocation3], 256  }
  0x25   :  { %234 = vsyncadd [#allocation3], 4294967040 }
  0x26   :  { %235 = dma.done.wait [#allocation6], 256  }
  0x27   :  { %236 = vsyncadd [#allocation6], 4294967040  ;;  %v69_v0 = vld [vmem:[#allocation2] sm:$0xff]  ;;  %v70_v1 = vld [vmem:[#allocation2 + $0x8] sm:$0xff]  ;;  %v245_v6 = vmov 0   ;;  %s246_s1 = smov [#allocation8]  }
  0x28   :  { %v71_v2 = vld [vmem:[#allocation5] sm:$0xff]  ;;  %v72_v3 = vld [vmem:[#allocation5 + $0x8] sm:$0xff]  ;;  %s117_s10 = sshll.u32 %s246_s1, 4  ;;  %s247_s11 = smov [#allocation7]   ;;  %s118_s10 = int_to_ptr.vmem [resolvable:$true] %s117_s10 }
  0x29   :  { %vm73_vm0 = vcmp.gt.f32.partialorder %v71_v2, 0.0  ;;  %v75_v4 = vsub.f32 %v69_v0, %v71_v2  ;;  %vm74_vm1 = vcmp.gt.f32.partialorder %v72_v3, 0.0  ;;  %v76_v5 = vsub.f32 %v70_v1, %v72_v3  ;;  %s107_s12 = sshll.u32 %s247_s11, 4  ;;  %s189_s13 = scalar_lea.vmem %s118_s10, 128  ;;  %s108_s12 = int_to_ptr.vmem [resolvable:$true] %s107_s12 }
  0x2a   :  { %v91_v7 = vsel %vm73_vm0, 1, %v245_v6  ;;  %v92_v10 = vsel %vm74_vm1, 1, %v245_v6  ;;  %p190_p2 = scmp.ne.s32.totalorder %s118_s10, %s189_s13  ;;  %p194_p3 = scmp.lt.s32.totalorder %s118_s10, %s118_s10 }
  0x2b   :  { %v77_v8 = vand.u32 2147483647, %v75_v4  ;;  %v81_v9 = vmul.f32 0.5, %v75_v4  ;;  %v78_v11 = vand.u32 2147483647, %v76_v5  ;;  %v82_v12 = vmul.f32 0.5, %v76_v5  ;;  %p195_p4 = scmp.lt.s32.totalorder %s189_s13, %s189_s13 }
  0x2c   :  { %v98_v13 = vadd.s32 %v92_v10, %v91_v7 }
  0x2d   :  { %vm79_vm2 = vcmp.lt.f32.partialorder %v77_v8, 1.0  ;;  %v83_v14 = vmul.f32 %v81_v9, %v75_v4  ;;  %v135_v15 = vadd.f32 -0.5, %v77_v8  ;;  %vm80_vm3 = vcmp.lt.f32.partialorder %v78_v11, 1.0  ;;  %p196_p5 = por %p195_p4, %p194_p3 }
  0x2e   :  { %v84_v16 = vmul.f32 %v82_v12, %v76_v5  ;;  %v136_v17 = vadd.f32 -0.5, %v78_v11  ;;  %100 = vst [vmem:[#allocation8] sm:$0xff] %v98_v13 }
  0x2f   :  { %v87_v18 = vsel %vm79_vm2, %v83_v14, %v135_v15  ;;  %p197_p6 = pnand %p196_p5, %p190_p2 }
  0x30   :  { %v88_v19 = vsel %vm80_vm3, %v84_v16, %v136_v17  ;;  %v89_v20 = vsel %vm73_vm0, %v87_v18, 0.0 }
  0x31   :  { %v90_v21 = vsel %vm74_vm1, %v88_v19, 0.0 }
  0x32   :  { %200 = shalt.err (!%p197_p6)
}
  0x33   :  { %s201_s16 = scalar_lea.hbm %s323_s3, 128 }
  0x34   :  { %p202_p7 = scmp.ne.s32.totalorder %s323_s3, %s201_s16  ;;  %p205_p8 = scmp.lt.u32.totalorder %s201_s16, %s323_s3 }
  0x36   :  { %p207_p9 = pnand %p205_p8, %p202_p7 }
  0x38   :  { %210 = shalt.err (!%p207_p9)
}
  0x39   :  { %120 = dma.vmem_to_hbm [thread:$0]  %s118_s10, 128, %s323_s3, [#allocation9]   ;;  %v94_v22 = vadd.f32 %v90_v21, %v89_v20 }
  0x3a   :  { %s211_s23 = scalar_lea.vmem %s108_s12, 128  ;;  %p216_p11 = scmp.lt.s32.totalorder %s108_s12, %s108_s12 }
  0x3b   :  { %96 = vst [vmem:[#allocation7] sm:$0xff] %v94_v22  ;;  %p212_p10 = scmp.ne.s32.totalorder %s108_s12, %s211_s23  ;;  %p217_p12 = scmp.lt.s32.totalorder %s211_s23, %s211_s23 }
  0x3d   :  { %p218_p13 = por %p217_p12, %p216_p11 }
  0x3f   :  { %p219_p0 = pnand %p218_p13, %p212_p10 }
  0x41   :  { %222 = shalt.err (!%p219_p0)
}
  0x42   :  { %s223_s26 = scalar_lea.hbm %s322_s2, 128 }
  0x43   :  { %p224_p1 = scmp.ne.s32.totalorder %s322_s2, %s223_s26  ;;  %p227_p2 = scmp.lt.u32.totalorder %s223_s26, %s322_s2 }
  0x45   :  { %p229_p3 = pnand %p227_p2, %p224_p1 }
  0x47   :  { %232 = shalt.err (!%p229_p3)
}
  0x48   :  { %110 = dma.vmem_to_hbm [thread:$0]  %s108_s12, 128, %s322_s2, [#allocation4]  }
  0x49   :  { %237 = dma.done.wait [#allocation4], 128  }
  0x4a   :  { %238 = vsyncadd [#allocation4], 4294967168 }
  0x4b   :  { %239 = dma.done.wait [#allocation9], 128  }
  0x4c   :  { %240 = vsyncadd [#allocation9], 4294967168 }
  0x4d   :  { %127 = vsyncpa [#allocation3], 1 }
  0x4e   :  { %128 = vsyncpa [#allocation6], 1 }
  0x4f   :  { %129 = vsyncpa [#allocation4], 1 }
  0x50   :  { %130 = vsyncpa [#allocation9], 1 }

</bundles_post_ra>
